<compile_context>
chip_gen: v7x
topology: tpu7x:2x2x1
jax: 0.10.0
libtpu: 0.0.40
codegen_flags: <defaults>
</compile_context>

<pallas_src>
import math
import jax
import jax.numpy as jnp
from jax.experimental import pallas as pl
from jax.experimental.pallas import tpu as pltpu


def _make_encoder_kernel(n_layers, d_in):
    """Kernel factory: builds a fused (MLP + concat) kernel for n_layers layers."""

    def kernel(x_ref, *refs):
        # refs = (w0, b0, w1, b1, ..., w_{L-1}, b_{L-1}, out_ref)
        out_ref = refs[-1]
        x0 = x_ref[...]                     # [tm, d_in]
        h = x0
        for i in range(n_layers):           # statically unrolled
            w = refs[2 * i][...]            # [d_i, d_{i+1}]  (pre-transposed)
            b = refs[2 * i + 1][...]        # [1,  d_{i+1}]
            h = jnp.dot(h, w, preferred_element_type=jnp.float32) + b
            h = jnp.maximum(h, 0.0)         # ReLU (VPU)
        # concat((x, lifted), -1) done in-kernel as two sub-tile stores.
        out_ref[:, :d_in] = x0.astype(out_ref.dtype)
        out_ref[:, d_in:] = h.astype(out_ref.dtype)

    return kernel


def init_encoder_params(key, struct):
    """PyTorch nn.Linear default init; weights stored PRE-TRANSPOSED as [in, out]."""
    params = []
    for i in range(len(struct) - 1):
        fan_in, fan_out = struct[i], struct[i + 1]
        key, kw, kb = jax.random.split(key, 3)
        bound = 1.0 / math.sqrt(fan_in)
        w = jax.random.uniform(kw, (fan_out, fan_in), jnp.float32, -bound, bound)
        b = jax.random.uniform(kb, (1, fan_out), jnp.float32, -bound, bound)
        params.append((w.T, b))             # transpose ONCE here, never per forward
    return params


@jax.jit
def encoder_forward(params, x):
    """out = concat(x, relu(...relu(x @ W0 + b0)... @ W_{L-1} + b_{L-1}), -1)."""
    B, d_in = x.shape
    d_out = params[-1][0].shape[1]
    n_layers = len(params)

    # Batch tiling: 128-row tiles (good for all of v5e/v6e/v7x) when the batch
    # allows; otherwise the whole batch as one (full-dim, hence legal) tile.
    tm = 128 if (B % 128 == 0) else B
    grid = (B // tm,)

    in_specs = [pl.BlockSpec((tm, d_in), lambda i: (i, 0))]
    for (w, b) in params:
        # Constant index_map -> weight/bias DMA'd once, VMEM-resident across tiles.
        in_specs.append(pl.BlockSpec(w.shape, lambda i: (0, 0)))
        in_specs.append(pl.BlockSpec(b.shape, lambda i: (0, 0)))
    out_specs = pl.BlockSpec((tm, d_in + d_out), lambda i: (i, 0))

    flat_inputs = [x]
    for (w, b) in params:
        flat_inputs += [w, b]

    return pl.pallas_call(
        _make_encoder_kernel(n_layers, d_in),
        out_shape=jax.ShapeDtypeStruct((B, d_in + d_out), x.dtype),
        grid=grid,
        in_specs=in_specs,
        out_specs=out_specs,
        compiler_params=pltpu.CompilerParams(
            # Batch tiles are independent -> shard across both TCs on v7x.
            dimension_semantics=("parallel",)
        ),
    )(*flat_inputs)


if __name__ == "__main__":
    struct = (4, 32, 32)        # encoder(struct): two (Linear+ReLU) layers, 4 -> 32
    batch = 256                 # two 128-row tiles -> real grid, megacore-parallel

    key = jax.random.PRNGKey(0)
    kp, kx = jax.random.split(key)
    params = init_encoder_params(kp, struct)
    x = jax.random.normal(kx, (batch, struct[0]), jnp.float32)

    out = encoder_forward(params, x)
    jax.block_until_ready(out)

    # Plain-JAX reference
    h = x
    for (wT, b) in params:
        h = jnp.maximum(h @ wT + b, 0.0)
    ref = jnp.concatenate([x, h], axis=-1)

    assert out.shape == (batch, struct[0] + struct[-1])
    assert jnp.allclose(out, ref, atol=1e-5, rtol=1e-5)

    print("KERNEL_OK")
</pallas_src>

<mosaic_0001>
module attributes {stable_mosaic.version = 11 : i64} {
  func.func @kernel(%arg0: i32, %arg1: memref<128x4xf32, #tpu.memory_space<vmem>>, %arg2: memref<4x32xf32, #tpu.memory_space<vmem>>, %arg3: memref<1x32xf32, #tpu.memory_space<vmem>>, %arg4: memref<32x32xf32, #tpu.memory_space<vmem>>, %arg5: memref<1x32xf32, #tpu.memory_space<vmem>>, %arg6: memref<128x36xf32, #tpu.memory_space<vmem>>) attributes {dimension_semantics = [#tpu.dimension_semantics<parallel>], iteration_bounds = array<i64: 2>, scalar_prefetch = 0 : i64, scratch_operands = 0 : i64, tpu.core_type = #tpu.core_type<tc>, window_params = [{transform_indices = @transform_0, window_bounds = array<i64: 128, 4>}, {pipeline_mode = #tpu.pipeline_mode<synchronous>, transform_indices = @transform_1, window_bounds = array<i64: 4, 32>}, {pipeline_mode = #tpu.pipeline_mode<synchronous>, transform_indices = @transform_2, window_bounds = array<i64: 1, 32>}, {pipeline_mode = #tpu.pipeline_mode<synchronous>, transform_indices = @transform_3, window_bounds = array<i64: 32, 32>}, {pipeline_mode = #tpu.pipeline_mode<synchronous>, transform_indices = @transform_4, window_bounds = array<i64: 1, 32>}, {transform_indices = @transform_5, window_bounds = array<i64: 128, 36>}]} {
    %c0 = arith.constant 0 : index
    %c0_0 = arith.constant 0 : index
    %0 = vector.load %arg1[%c0, %c0_0] : memref<128x4xf32, #tpu.memory_space<vmem>>, vector<128x4xf32>
    %c0_1 = arith.constant 0 : index
    %c0_2 = arith.constant 0 : index
    %1 = vector.load %arg2[%c0_1, %c0_2] : memref<4x32xf32, #tpu.memory_space<vmem>>, vector<4x32xf32>
    %c0_3 = arith.constant 0 : index
    %c0_4 = arith.constant 0 : index
    %2 = vector.load %arg3[%c0_3, %c0_4] : memref<1x32xf32, #tpu.memory_space<vmem>>, vector<1x32xf32>
    %cst = arith.constant dense<0.000000e+00> : vector<128x32xf32>
    %3 = tpu.matmul %0, %1, %cst {dimension_numbers = #tpu.dot_dimension_numbers<[1], [0], [0], [1], [0, 0, 1, 1], [], []>} : vector<128x4xf32>, vector<4x32xf32>, vector<128x32xf32> -> vector<128x32xf32>
    %4 = vector.broadcast %2 : vector<1x32xf32> to vector<128x32xf32>
    %5 = arith.addf %3, %4 : vector<128x32xf32>
    %cst_5 = arith.constant 0.000000e+00 : f32
    %6 = vector.broadcast %cst_5 : f32 to vector<128x32xf32>
    %7 = arith.maximumf %5, %6 : vector<128x32xf32>
    %c0_6 = arith.constant 0 : index
    %c0_7 = arith.constant 0 : index
    %8 = vector.load %arg4[%c0_6, %c0_7] : memref<32x32xf32, #tpu.memory_space<vmem>>, vector<32x32xf32>
    %c0_8 = arith.constant 0 : index
    %c0_9 = arith.constant 0 : index
    %9 = vector.load %arg5[%c0_8, %c0_9] : memref<1x32xf32, #tpu.memory_space<vmem>>, vector<1x32xf32>
    %cst_10 = arith.constant dense<0.000000e+00> : vector<128x32xf32>
    %10 = tpu.matmul %7, %8, %cst_10 {dimension_numbers = #tpu.dot_dimension_numbers<[1], [0], [0], [1], [0, 0, 1, 1], [], []>} : vector<128x32xf32>, vector<32x32xf32>, vector<128x32xf32> -> vector<128x32xf32>
    %11 = vector.broadcast %9 : vector<1x32xf32> to vector<128x32xf32>
    %12 = arith.addf %10, %11 : vector<128x32xf32>
    %cst_11 = arith.constant 0.000000e+00 : f32
    %13 = vector.broadcast %cst_11 : f32 to vector<128x32xf32>
    %14 = arith.maximumf %12, %13 : vector<128x32xf32>
    %c0_12 = arith.constant 0 : index
    %c0_13 = arith.constant 0 : index
    %15 = vector.load %arg6[%c0_12, %c0_13] : memref<128x36xf32, #tpu.memory_space<vmem>>, vector<128x4xf32>
    tpu.vector_store %arg6[%c0_12, %c0_13], %0 {strides = array<i32>} : memref<128x36xf32, #tpu.memory_space<vmem>>, vector<128x4xf32>,
    %c0_14 = arith.constant 0 : index
    %c4 = arith.constant 4 : index
    %16 = vector.load %arg6[%c0_14, %c4] : memref<128x36xf32, #tpu.memory_space<vmem>>, vector<128x32xf32>
    tpu.vector_store %arg6[%c0_14, %c4], %14 {strides = array<i32>} : memref<128x36xf32, #tpu.memory_space<vmem>>, vector<128x32xf32>,
    return
  }
  func.func @transform_0(%arg0: i32) -> (i32, i32) {
    %c0_i32 = arith.constant 0 : i32
    %c0_i32_0 = arith.constant 0 : i32
    return %arg0, %c0_i32 : i32, i32
  }
  func.func @transform_1(%arg0: i32) -> (i32, i32) {
    %c0_i32 = arith.constant 0 : i32
    %c0_i32_0 = arith.constant 0 : i32
    %c0_i32_1 = arith.constant 0 : i32
    return %c0_i32, %c0_i32_0 : i32, i32
  }
  func.func @transform_2(%arg0: i32) -> (i32, i32) {
    %c0_i32 = arith.constant 0 : i32
    %c0_i32_0 = arith.constant 0 : i32
    %c0_i32_1 = arith.constant 0 : i32
    return %c0_i32, %c0_i32_0 : i32, i32
  }
  func.func @transform_3(%arg0: i32) -> (i32, i32) {
    %c0_i32 = arith.constant 0 : i32
    %c0_i32_0 = arith.constant 0 : i32
    %c0_i32_1 = arith.constant 0 : i32
    return %c0_i32, %c0_i32_0 : i32, i32
  }
  func.func @transform_4(%arg0: i32) -> (i32, i32) {
    %c0_i32 = arith.constant 0 : i32
    %c0_i32_0 = arith.constant 0 : i32
    %c0_i32_1 = arith.constant 0 : i32
    return %c0_i32, %c0_i32_0 : i32, i32
  }
  func.func @transform_5(%arg0: i32) -> (i32, i32) {
    %c0_i32 = arith.constant 0 : i32
    %c0_i32_0 = arith.constant 0 : i32
    return %arg0, %c0_i32 : i32, i32
  }
}

</mosaic_0001>

<bundles_post_ra>
// kernel: encoder_forward.1
= control target key start
LH: loop header
LB: loop body
LE: loop exit
PB: predicated region body
PF: predicated region fallthrough
CT: control target
= control target key end

     0   :  { %s1037_s18 = smov 0   ;;  %s1207_s0 = inlined_call_operand.vmem [shape: f32[256,4], index: 0, kind: input, shape index: {}]   ;;  %s1208_s1 = inlined_call_operand.vmem [shape: f32[4,32], index: 1, kind: input, shape index: {}]   ;;  %s1209_s2 = inlined_call_operand.vmem [shape: f32[1,32], index: 2, kind: input, shape index: {}]   ;;  %s1210_s3 = inlined_call_operand.vmem [shape: f32[32,32], index: 3, kind: input, shape index: {}]   ;;  %s1211_s4 = inlined_call_operand.vmem [shape: f32[1,32], index: 4, kind: input, shape index: {}]   ;;  %s1212_s5 = inlined_call_operand.vmem [shape: f32[256,36], index: 5, kind: output, shape index: {}]  }
   0x1 LB: > { %s840_s19 = sadd.s32 4294967295, %s1004_s18   ;;  %p844_p0 = scmp.ge.s32.totalorder %s1004_s18, 1  ;;  %s1004_s18 = sphi %s1037_s18, %s15_s18  }
   0x2   : > { %p188_p1 = scmp.lt.s32.totalorder %s1004_s18, 3 }
   0x4   : > { %p189_p2 = pnand %p844_p0, %p188_p1 }
   0x5   : > { %v244_v0 = vld [vmem:[%s1208_s1] sm:$0xf] (!%p189_p2)  ;;  %vm301_vm0 = vcmask (!%p189_p2), 1043456   ;;  %s845_s22 = sshll.u32 (!%p189_p2), %s840_s19, 4  ;;  %v467_v2 = vld [vmem:[%s1210_s3 + $0x8] sm:$0xff] (!%p189_p2)  ;;  %vm252_vm1 = vcmask (!%p189_p2), 31744  }
   0x6   : > { %192 = sbr.rel (%p189_p2) target bundleno = 600 (0x258), region = 40  ;;  %v466_v1 = vld [vmem:[%s1210_s3] sm:$0xff] (!%p189_p2)  ;;  %923 = vmatprep.subr.msk.mxu0 (!%p189_p2), %vm301_vm0, %v244_v0  ;;  %p217_p3 = scmp.lt.s32.totalorder (!%p189_p2), %s845_s22, 31  ;;  %v468_v20 = vld [vmem:[%s1210_s3 + $0x10] sm:$0xff] (!%p189_p2)  ;;  %v469_v21 = vld [vmem:[%s1210_s3 + $0x18] sm:$0xff] (!%p189_p2)  ;;  %vm477_vm2 = vcmask (!%p189_p2), 261120  }
   0x7   : > { %924 = vmatpush3.msk.msra.mxu0 (!%p189_p2), %vm301_vm0, %v244_v0  ;;  %v981_v3 = vpack.c.bf16 (!%p189_p2), %v467_v2, %v466_v1  ;;  %v985_v22 = vpack.c.bf16 (!%p189_p2), %v469_v21, %v468_v20  ;;  %v849_v23 = vld [vmem:[%s1209_s2] ss:$0 sm:$0xff] (!%p189_p2)  ;;  %s1006_s17 = smov (!%p189_p2), 4   ;;  %vm767_vm3 = vcmask (!%p189_p2), 293920  }
   0x9   : > { %982 = vmatprep.subr.bf16.mxu1 (!%p189_p2), %v981_v3 }
   0xa   : > { %984 = vmatpush3.bf16.msra.mxu1 (!%p189_p2), %v981_v3 }
   0xb   : > { %986 = vmatprep.subr.bf16.mxu1 (!%p189_p2), %v985_v22 }
   0xd   : > { %s1214_s22 = smov (!%p217_p3, %s845_s22), 31 }
   0xe   : > { %s846_s27 = sshll.u32 %s1214_s22, 3  ;;  %988 = vmatpush3.bf16.msra.mxu1 %v985_v22 }
   0xf   : > { %s1057_s30 = scalar_lea.vmem %s1207_s0, %s846_s27  ;;  %s1062_s8 = scalar_lea.vmem %s1212_s5, %s846_s27 }
  0x10   : > { %v228_v4 = vld [vmem:[%s1057_s30] sm:$0xff]  ;;  %v229_v5 = vld [vmem:[%s1057_s30 + $0x8] sm:$0xff]  ;;  %v230_v6 = vld [vmem:[%s1057_s30 + $0x10] sm:$0xff] }
  0x11   : > { %925 = vmatprep.mubr.msk.f32.mxu0 %vm252_vm1, %v228_v4  ;;  %687 = vst.msk [vmem:[%s1062_s8] sm:$0xff] %vm252_vm1, %v228_v4  ;;  %688 = vst.msk [vmem:[%s1062_s8 + $0x8] sm:$0xff] %vm252_vm1, %v229_v5  ;;  %v231_v7 = vld [vmem:[%s1057_s30 + $0x18] sm:$0xff]  ;;  %v232_v8 = vld [vmem:[%s1057_s30 + $0x20] sm:$0xff] }
  0x12   : > { %689 = vst.msk [vmem:[%s1062_s8 + $0x10] sm:$0xff] %vm252_vm1, %v230_v6  ;;  %v233_v9 = vld [vmem:[%s1057_s30 + $0x28] sm:$0xff]  ;;  %926 = vmatmul.mubr.msk.f32.vlgmr.msra.gmra.mrb[0].mxu0 %vm252_vm1, %v229_v5  ;;  %690 = vst.msk [vmem:[%s1062_s8 + $0x18] sm:$0xff] %vm252_vm1, %v231_v7  ;;  %v234_v10 = vld [vmem:[%s1057_s30 + $0x30] sm:$0xff] }
  0x13   : > { %691 = vst.msk [vmem:[%s1062_s8 + $0x20] sm:$0xff] %vm252_vm1, %v232_v8  ;;  %692 = vst.msk [vmem:[%s1062_s8 + $0x28] sm:$0xff] %vm252_vm1, %v233_v9  ;;  %v235_v11 = vld [vmem:[%s1057_s30 + $0x38] sm:$0xff]  ;;  %v236_v12 = vld [vmem:[%s1057_s30 + $0x40] sm:$0xff]  ;;  %928 = vmatprep.mubr.msk.f32.mxu0 %vm252_vm1, %v230_v6 }
  0x14   : > { %693 = vst.msk [vmem:[%s1062_s8 + $0x30] sm:$0xff] %vm252_vm1, %v234_v10  ;;  %694 = vst.msk [vmem:[%s1062_s8 + $0x38] sm:$0xff] %vm252_vm1, %v235_v11  ;;  %v237_v13 = vld [vmem:[%s1057_s30 + $0x48] sm:$0xff]  ;;  %v238_v14 = vld [vmem:[%s1057_s30 + $0x50] sm:$0xff] }
  0x15   : > { %695 = vst.msk [vmem:[%s1062_s8 + $0x40] sm:$0xff] %vm252_vm1, %v236_v12  ;;  %v239_v15 = vld [vmem:[%s1057_s30 + $0x58] sm:$0xff]  ;;  %696 = vst.msk [vmem:[%s1062_s8 + $0x48] sm:$0xff] %vm252_vm1, %v237_v13  ;;  %v240_v16 = vld [vmem:[%s1057_s30 + $0x60] sm:$0xff] }
  0x16   : > { %697 = vst.msk [vmem:[%s1062_s8 + $0x50] sm:$0xff] %vm252_vm1, %v238_v14  ;;  %698 = vst.msk [vmem:[%s1062_s8 + $0x58] sm:$0xff] %vm252_vm1, %v239_v15  ;;  %v241_v17 = vld [vmem:[%s1057_s30 + $0x68] sm:$0xff]  ;;  %v242_v18 = vld [vmem:[%s1057_s30 + $0x70] sm:$0xff]  ;;  %929 = vmatmul.mubr.msk.f32.gmra.mrb[2].mxu0 %vm252_vm1, %v231_v7 }
  0x17   : > { %699 = vst.msk [vmem:[%s1062_s8 + $0x60] sm:$0xff] %vm252_vm1, %v240_v16  ;;  %700 = vst.msk [vmem:[%s1062_s8 + $0x68] sm:$0xff] %vm252_vm1, %v241_v17  ;;  %v243_v19 = vld [vmem:[%s1057_s30 + $0x78] sm:$0xff]  ;;  %931 = vmatprep.mubr.msk.f32.mxu0 %vm252_vm1, %v232_v8  ;;  %v867_v8 = vld [vmem:[%s1211_s4] ss:$0 sm:$0xff] }
  0x18   : > { %701 = vst.msk [vmem:[%s1062_s8 + $0x70] sm:$0xff] %vm252_vm1, %v242_v18  ;;  %702 = vst.msk [vmem:[%s1062_s8 + $0x78] sm:$0xff] %vm252_vm1, %v243_v19 }
  0x1a   : > { %932 = vmatmul.mubr.msk.f32.gmra.mrb[4].mxu0 %vm252_vm1, %v233_v9 }
  0x1b   : > { %934 = vmatprep.mubr.msk.f32.mxu0 %vm252_vm1, %v234_v10 }
  0x1e   : > { %935 = vmatmul.mubr.msk.f32.gmra.mrb[6].mxu0 %vm252_vm1, %v235_v11 }
  0x1f   : > { %937 = vmatprep.mubr.msk.f32.mxu0 %vm252_vm1, %v236_v12 }
  0x22   : > { %938 = vmatmul.mubr.msk.f32.gmra.mrb[8].mxu0 %vm252_vm1, %v237_v13 }
  0x23   : > { %940 = vmatprep.mubr.msk.f32.mxu0 %vm252_vm1, %v238_v14 }
  0x26   : > { %941 = vmatmul.mubr.msk.f32.gmra.mrb[10].mxu0 %vm252_vm1, %v239_v15 }
  0x27   : > { %943 = vmatprep.mubr.msk.f32.mxu0 %vm252_vm1, %v240_v16 }
  0x2a   : > { %944 = vmatmul.mubr.msk.f32.gmra.mrb[12].mxu0 %vm252_vm1, %v241_v17 }
  0x2b   : > { %946 = vmatprep.mubr.msk.f32.mxu0 %vm252_vm1, %v242_v18 }
  0x2e   : > { %947 = vmatmul.mubr.msk.f32.gmra.mrb[14].mxu0 %vm252_vm1, %v243_v19 }
  0xe5   : > { %v927_v24 = vpop.f32.mrb[0].mxu0 }
  0xe6   : > { %v377_v25 = vadd.f32 %v927_v24, %v849_v23  ;;  %v371_v26 = vpop.f32.mrb[1].mxu0 }
  0xe7   : > { %v372_v27 = vadd.f32 %v849_v23, %v371_v26 }
  0xe8   : > { %v451_v30 = vmax.f32 %v377_v25, 0.0 }
  0xe9   : > { %v450_v28 = vmax.f32 %v372_v27, 0.0  ;;  %v930_v29 = vpop.f32.mrb[2].mxu0 }
  0xea   : > { %v387_v31 = vadd.f32 %v930_v29, %v849_v23  ;;  %v381_v32 = vpop.f32.mrb[3].mxu0 }
  0xeb   : > { %v382_v33 = vadd.f32 %v849_v23, %v381_v32  ;;  %957 = vmatprep.mubr.msk.f32.mxu1 %vm477_vm2, %v450_v28 }
  0xec   : > { %958 = vmatmul.mubr.msk.f32.vlgmr.msra.gmra.mrb[0].mxu1 %vm477_vm2, %v451_v30  ;;  %v453_v36 = vmax.f32 %v387_v31, 0.0 }
  0xed   : > { %v452_v34 = vmax.f32 %v382_v33, 0.0  ;;  %v933_v35 = vpop.f32.mrb[4].mxu0 }
  0xee   : > { %v397_v37 = vadd.f32 %v933_v35, %v849_v23  ;;  %v391_v38 = vpop.f32.mrb[5].mxu0 }
  0xef   : > { %v392_v39 = vadd.f32 %v849_v23, %v391_v38  ;;  %960 = vmatprep.mubr.msk.f32.mxu1 %vm477_vm2, %v452_v34 }
  0xf0   : > { %v455_v40 = vmax.f32 %v397_v37, 0.0  ;;  %961 = vmatmul.mubr.msk.f32.gmra.mrb[2].mxu1 %vm477_vm2, %v453_v36 }
  0xf1   : > { %v454_v41 = vmax.f32 %v392_v39, 0.0  ;;  %v936_v42 = vpop.f32.mrb[6].mxu0 }
  0xf2   : > { %v407_v43 = vadd.f32 %v936_v42, %v849_v23  ;;  %v401_v44 = vpop.f32.mrb[7].mxu0 }
  0xf3   : > { %v402_v45 = vadd.f32 %v849_v23, %v401_v44  ;;  %963 = vmatprep.mubr.msk.f32.mxu1 %vm477_vm2, %v454_v41 }
  0xf4   : > { %v457_v46 = vmax.f32 %v407_v43, 0.0  ;;  %964 = vmatmul.mubr.msk.f32.gmra.mrb[4].mxu1 %vm477_vm2, %v455_v40 }
  0xf5   : > { %v456_v47 = vmax.f32 %v402_v45, 0.0  ;;  %v939_v48 = vpop.f32.mrb[8].mxu0 }
  0xf6   : > { %v417_v49 = vadd.f32 %v939_v48, %v849_v23  ;;  %v411_v50 = vpop.f32.mrb[9].mxu0 }
  0xf7   : > { %v412_v51 = vadd.f32 %v849_v23, %v411_v50  ;;  %966 = vmatprep.mubr.msk.f32.mxu1 %vm477_vm2, %v456_v47 }
  0xf8   : > { %v459_v52 = vmax.f32 %v417_v49, 0.0  ;;  %967 = vmatmul.mubr.msk.f32.gmra.mrb[6].mxu1 %vm477_vm2, %v457_v46 }
  0xf9   : > { %v458_v53 = vmax.f32 %v412_v51, 0.0  ;;  %v942_v54 = vpop.f32.mrb[10].mxu0 }
  0xfa   : > { %v427_v55 = vadd.f32 %v942_v54, %v849_v23  ;;  %v421_v56 = vpop.f32.mrb[11].mxu0 }
  0xfb   : > { %v422_v57 = vadd.f32 %v849_v23, %v421_v56  ;;  %969 = vmatprep.mubr.msk.f32.mxu1 %vm477_vm2, %v458_v53 }
  0xfc   : > { %v461_v58 = vmax.f32 %v427_v55, 0.0  ;;  %970 = vmatmul.mubr.msk.f32.gmra.mrb[8].mxu1 %vm477_vm2, %v459_v52 }
  0xfd   : > { %v460_v59 = vmax.f32 %v422_v57, 0.0  ;;  %v945_v60 = vpop.f32.mrb[12].mxu0 }
  0xfe   : > { %v437_v61 = vadd.f32 %v945_v60, %v849_v23  ;;  %v431_v62 = vpop.f32.mrb[13].mxu0 }
  0xff   : > { %v432_v63 = vadd.f32 %v849_v23, %v431_v62  ;;  %972 = vmatprep.mubr.msk.f32.mxu1 %vm477_vm2, %v460_v59 }
 0x100   : > { %v463_v0 = vmax.f32 %v437_v61, 0.0  ;;  %973 = vmatmul.mubr.msk.f32.gmra.mrb[10].mxu1 %vm477_vm2, %v461_v58 }
 0x101   : > { %v462_v1 = vmax.f32 %v432_v63, 0.0  ;;  %v948_v2 = vpop.f32.mrb[14].mxu0 }
 0x102   : > { %v447_v3 = vadd.f32 %v948_v2, %v849_v23  ;;  %v441_v4 = vpop.f32.mrb[15].mxu0 }
 0x103   : > { %v442_v5 = vadd.f32 %v849_v23, %v441_v4  ;;  %975 = vmatprep.mubr.msk.f32.mxu1 %vm477_vm2, %v462_v1 }
 0x104   : > { %v465_v6 = vmax.f32 %v447_v3, 0.0  ;;  %976 = vmatmul.mubr.msk.f32.gmra.mrb[12].mxu1 %vm477_vm2, %v463_v0 }
 0x105   : > { %v464_v7 = vmax.f32 %v442_v5, 0.0 }
 0x107   : > { %978 = vmatprep.mubr.msk.f32.mxu1 %vm477_vm2, %v464_v7 }
 0x108   : > { %979 = vmatmul.mubr.msk.f32.gmra.mrb[14].mxu1 %vm477_vm2, %v465_v6 }
 0x1bf   : > { %v959_v9 = vpop.f32.mrb[0].mxu1 }
 0x1c0   : > { %v598_v10 = vadd.f32 %v959_v9, %v867_v8  ;;  %v592_v11 = vpop.f32.mrb[1].mxu1 }
 0x1c1   : > { %v593_v13 = vadd.f32 %v867_v8, %v592_v11 }
 0x1c2   : > { %v672_v12 = vmax.f32 %v598_v10, 0.0 }
 0x1c3   : > { %v962_v14 = vpop.f32.mrb[2].mxu1  ;;  %v671_v17 = vmax.f32 %v593_v13, 0.0 }
 0x1c4   : > { %v608_v15 = vadd.f32 %v962_v14, %v867_v8  ;;  %721 = vrot.lane.b32.xlu0 %v672_v12, %s1006_s17  ;;  %v602_v16 = vpop.f32.mrb[3].mxu1 }
 0x1c5   : > { %v603_v19 = vadd.f32 %v867_v8, %v602_v16 }
 0x1c6   : > { %v674_v18 = vmax.f32 %v608_v15, 0.0 }
 0x1c7   : > { %v965_v20 = vpop.f32.mrb[4].mxu1  ;;  %v673_v23 = vmax.f32 %v603_v19, 0.0 }
 0x1c8   : > { %725 = vrot.lane.b32.xlu1 %v674_v18, %s1006_s17  ;;  %v612_v21 = vpop.f32.mrb[5].mxu1  ;;  %719 = vrot.lane.b32.xlu0 %v671_v17, %s1006_s17  ;;  %v618_v24 = vadd.f32 %v965_v20, %v867_v8 }
 0x1c9   : > { %v613_v22 = vadd.f32 %v867_v8, %v612_v21 }
 0x1ca   : > { %v676_v29 = vmax.f32 %v618_v24, 0.0 }
 0x1cb   : > { %v675_v25 = vmax.f32 %v613_v22, 0.0  ;;  %v968_v26 = vpop.f32.mrb[6].mxu1 }
 0x1cc   : > { %v622_v27 = vpop.f32.mrb[7].mxu1  ;;  %723 = vrot.lane.b32.xlu1 %v673_v23, %s1006_s17  ;;  %v628_v30 = vadd.f32 %v968_v26, %v867_v8 }
 0x1cd   : > { %v623_v28 = vadd.f32 %v867_v8, %v622_v27  ;;  %727 = vrot.lane.b32.xlu0 %v675_v25, %s1006_s17 }
 0x1ce   : > { %v678_v35 = vmax.f32 %v628_v30, 0.0 }
 0x1cf   : > { %v677_v31 = vmax.f32 %v623_v28, 0.0  ;;  %v971_v32 = vpop.f32.mrb[8].mxu1 }
 0x1d0   : > { %v632_v33 = vpop.f32.mrb[9].mxu1  ;;  %729 = vrot.lane.b32.xlu1 %v676_v29, %s1006_s17  ;;  %v638_v36 = vadd.f32 %v971_v32, %v867_v8 }
 0x1d1   : > { %v633_v34 = vadd.f32 %v867_v8, %v632_v33  ;;  %731 = vrot.lane.b32.xlu0 %v677_v31, %s1006_s17 }
 0x1d2   : > { %v680_v41 = vmax.f32 %v638_v36, 0.0 }
 0x1d3   : > { %v679_v37 = vmax.f32 %v633_v34, 0.0  ;;  %v974_v38 = vpop.f32.mrb[10].mxu1 }
 0x1d4   : > { %v642_v39 = vpop.f32.mrb[11].mxu1  ;;  %733 = vrot.lane.b32.xlu1 %v678_v35, %s1006_s17  ;;  %v648_v42 = vadd.f32 %v974_v38, %v867_v8 }
 0x1d5   : > { %v643_v40 = vadd.f32 %v867_v8, %v642_v39  ;;  %735 = vrot.lane.b32.xlu0 %v679_v37, %s1006_s17 }
 0x1d6   : > { %v682_v47 = vmax.f32 %v648_v42, 0.0 }
 0x1d7   : > { %v681_v43 = vmax.f32 %v643_v40, 0.0  ;;  %v977_v44 = vpop.f32.mrb[12].mxu1 }
 0x1d8   : > { %v652_v45 = vpop.f32.mrb[13].mxu1  ;;  %737 = vrot.lane.b32.xlu1 %v680_v41, %s1006_s17  ;;  %v658_v48 = vadd.f32 %v977_v44, %v867_v8 }
 0x1d9   : > { %v653_v46 = vadd.f32 %v867_v8, %v652_v45  ;;  %739 = vrot.lane.b32.xlu0 %v681_v43, %s1006_s17 }
 0x1da   : > { %v684_v53 = vmax.f32 %v658_v48, 0.0 }
 0x1db   : > { %v683_v49 = vmax.f32 %v653_v46, 0.0  ;;  %v980_v50 = vpop.f32.mrb[14].mxu1 }
 0x1dc   : > { %v662_v51 = vpop.f32.mrb[15].mxu1  ;;  %741 = vrot.lane.b32.xlu1 %v682_v47, %s1006_s17  ;;  %v668_v54 = vadd.f32 %v980_v50, %v867_v8 }
 0x1dd   : > { %v663_v52 = vadd.f32 %v867_v8, %v662_v51  ;;  %743 = vrot.lane.b32.xlu0 %v683_v49, %s1006_s17 }
 0x1de   : > { %v686_v56 = vmax.f32 %v668_v54, 0.0 }
 0x1df   : > { %v685_v55 = vmax.f32 %v663_v52, 0.0 }
 0x1e0   : > { %745 = vrot.lane.b32.xlu1 %v684_v53, %s1006_s17 }
 0x1e1   : > { %747 = vrot.lane.b32.xlu0 %v685_v55, %s1006_s17 }
 0x1e4   : > { %749 = vrot.lane.b32.xlu1 %v686_v56, %s1006_s17 }
 0x236   : > { %v722_v57 = vpop.permute.xlu0 %721 }
 0x237   : > { %769 = vst.msk [vmem:[%s1062_s8 + $0x8] sm:$0xff] %vm767_vm3, %v722_v57 }
 0x23a   : > { %v726_v58 = vpop.permute.xlu1 %725  ;;  %v720_v59 = vpop.permute.xlu0 %719 }
 0x23b   : > { %771 = vst.msk [vmem:[%s1062_s8 + $0x18] sm:$0xff] %vm767_vm3, %v726_v58  ;;  %768 = vst.msk [vmem:[%s1062_s8] sm:$0xff] %vm767_vm3, %v720_v59 }
 0x23e   : > { %v724_v60 = vpop.permute.xlu1 %723 }
 0x23f   : > { %770 = vst.msk [vmem:[%s1062_s8 + $0x10] sm:$0xff] %vm767_vm3, %v724_v60  ;;  %v728_v61 = vpop.permute.xlu0 %727 }
 0x240   : > { %772 = vst.msk [vmem:[%s1062_s8 + $0x20] sm:$0xff] %vm767_vm3, %v728_v61 }
 0x242   : > { %v730_v62 = vpop.permute.xlu1 %729 }
 0x243   : > { %773 = vst.msk [vmem:[%s1062_s8 + $0x28] sm:$0xff] %vm767_vm3, %v730_v62  ;;  %v732_v63 = vpop.permute.xlu0 %731 }
 0x244   : > { %774 = vst.msk [vmem:[%s1062_s8 + $0x30] sm:$0xff] %vm767_vm3, %v732_v63 }
 0x246   : > { %v734_v0 = vpop.permute.xlu1 %733 }
 0x247   : > { %775 = vst.msk [vmem:[%s1062_s8 + $0x38] sm:$0xff] %vm767_vm3, %v734_v0  ;;  %v736_v1 = vpop.permute.xlu0 %735 }
 0x248   : > { %776 = vst.msk [vmem:[%s1062_s8 + $0x40] sm:$0xff] %vm767_vm3, %v736_v1 }
 0x24a   : > { %v738_v2 = vpop.permute.xlu1 %737 }
 0x24b   : > { %777 = vst.msk [vmem:[%s1062_s8 + $0x48] sm:$0xff] %vm767_vm3, %v738_v2  ;;  %v740_v3 = vpop.permute.xlu0 %739 }
 0x24c   : > { %778 = vst.msk [vmem:[%s1062_s8 + $0x50] sm:$0xff] %vm767_vm3, %v740_v3 }
 0x24e   : > { %v742_v4 = vpop.permute.xlu1 %741 }
 0x24f   : > { %779 = vst.msk [vmem:[%s1062_s8 + $0x58] sm:$0xff] %vm767_vm3, %v742_v4  ;;  %v744_v5 = vpop.permute.xlu0 %743 }
 0x250   : > { %780 = vst.msk [vmem:[%s1062_s8 + $0x60] sm:$0xff] %vm767_vm3, %v744_v5 }
 0x252   : > { %v746_v6 = vpop.permute.xlu1 %745 }
 0x253   : > { %781 = vst.msk [vmem:[%s1062_s8 + $0x68] sm:$0xff] %vm767_vm3, %v746_v6  ;;  %v748_v7 = vpop.permute.xlu0 %747 }
 0x254   : > { %782 = vst.msk [vmem:[%s1062_s8 + $0x70] sm:$0xff] %vm767_vm3, %v748_v7 }
 0x256   : > { %v750_v8 = vpop.permute.xlu1 %749 }
 0x257   : > { %783 = vst.msk [vmem:[%s1062_s8 + $0x78] sm:$0xff] %vm767_vm3, %v750_v8 }
 0x258 PF: > { %s15_s18 = sadd.s32 1, %s1004_s18  }
 0x259   : > { %p12_p4 = scmp.ge.s32.totalorder %s15_s18, 4  }
 0x25b   :  { %14 = sbr.rel (!%p12_p4) target bundleno = 1 (0x1), region = 70 }

</bundles_post_ra>
